<compile_context>
chip_gen: v6e
topology: v6e:2x2x1
jax: 0.10.0
libtpu: 0.0.40
codegen_flags: <defaults>
</compile_context>

<pallas_src>
import jax
import jax.numpy as jnp
import numpy as np
from jax.experimental import pallas as pl
from jax.experimental.pallas import tpu as pltpu


def _make_attention_kernel(num_l_chunks, chunk_len):
    def kernel(qp_ref, k_ref, v_ref, mask_ref, wa_ref, ba_ref, ctx_ref, w_ref):
        # qp_ref:   (TB, H)  f32   precomputed linear_q(q)
        # k_ref:    (TB, Lp, H)    native dtype
        # v_ref:    (TB, Lp, H)    native dtype
        # mask_ref: (TB, Lp) int32 1 == padded
        # wa_ref:   (1, H)   f32   linear_attn weight as a lane-dense row
        # ba_ref:   (1, 1)   f32
        # ctx_ref:  (TB, H)        v.dtype
        # w_ref:    (TB, Lp)       q.dtype
        f32 = jnp.float32
        qp = qp_ref[...].astype(f32)                                 # (TB, H)
        wa = wa_ref[...]                                             # (1, H)

        # linear_attn(tanh(k + qp)) computed in L chunks (static slices) so the
        # f32 `mid` temporary never exists at full (TB, Lp, H) size.
        chunk_logits = []
        for c in range(num_l_chunks):
            kc = k_ref[:, c * chunk_len:(c + 1) * chunk_len, :].astype(f32)
            midc = jnp.tanh(kc + qp[:, None, :])                     # (TB, CL, H)
            chunk_logits.append(jnp.sum(midc * wa, axis=-1))         # (TB, CL)
        logits = (chunk_logits[0] if num_l_chunks == 1
                  else jnp.concatenate(chunk_logits, axis=-1))
        logits = logits + ba_ref[...]                                # (TB, Lp)

        # mask padded positions to -inf (same as `logits[pad_mask] = -inf`).
        # NOTE: a row whose mask is entirely True softmaxes to NaN, matching
        # the PyTorch module.
        logits = jnp.where(mask_ref[...] > 0, -jnp.inf, logits)      # (TB, Lp)

        # softmax over L (the lane axis), kept in f32.
        m = jnp.max(logits, axis=-1, keepdims=True)                  # (TB, 1)
        e = jnp.exp(logits - m)                                      # (TB, Lp)
        s = jnp.sum(e, axis=-1, keepdims=True)                       # (TB, 1)
        # approx=True vrcp is not accurate to the 1e-5 f32 parity -> exact.
        w = e * pl.reciprocal(s, approx=False)                       # (TB, Lp)
        w_ref[...] = w.astype(w_ref.dtype)

        # context = weights @ v  -> batched (1, Lp) @ (Lp, H) on the MXU.
        # Keep v in its native dtype and cast the weights down instead.
        ctx = jnp.einsum('bql,blh->bqh',
                         w[:, None, :].astype(v_ref.dtype), v_ref[...],
                         preferred_element_type=f32)                 # (TB, 1, H)
        ctx_ref[...] = ctx[:, 0, :].astype(ctx_ref.dtype)
    return kernel


def attention_pallas(q, k, v, pad_mask, wq, bq, wa, ba):
    """q: [B,H]; k,v: [B,L,H]; pad_mask: [B,L] bool/int (True/1 == padding).
    wq: [H,H], bq: [H], wa: [1,H], ba: [1]  (PyTorch nn.Linear conventions)."""
    B, L, H = k.shape
    assert q.shape == (B, H)
    f32 = jnp.float32

    # --- hoist linear_q: one full-batch matmul in XLA (fills the MXU, keeps the
    #     HxH weight out of per-step VMEM) ---
    qp = q.astype(f32) @ wq.T.astype(f32) + bq.astype(f32)[None, :]   # (B, H)

    # --- static tiling decisions ---
    itemsizes = [jnp.dtype(x.dtype).itemsize for x in (q, k, v)]
    sub = 16 if min(itemsizes) < 4 else 8          # sublane alignment for TB

    # L chunking: bounds the f32 `mid` temp and keeps the weights lane axis
    # 128-aligned for large / ragged L.
    CL = L if L <= 128 else 128
    Lp = ((L + CL - 1) // CL) * CL
    n_chunks = Lp // CL

    # Batch tile from a ~4 MiB per k/v block VMEM budget.
    kv_item = max(jnp.dtype(k.dtype).itemsize, jnp.dtype(v.dtype).itemsize)
    per_item_bytes = Lp * H * kv_item
    target_block_bytes = 4 << 20
    if B <= sub:
        TB = B                                     # tiny batch: one full-dim block
    else:
        tb_budget = max(sub, (target_block_bytes // per_item_bytes) // sub * sub)
        tb_half = max(sub, (B // 2) // sub * sub)  # keep >= 2 grid steps (v7x megacore)
        TB = int(max(sub, min(tb_budget, tb_half)))
    Bp = ((B + TB - 1) // TB) * TB
    # TODO(synk): for L*H so large that even a TB=sub k/v block overflows VMEM
    # (v7x: 64 MiB), add a second "arbitrary" grid axis over L with an online
    # softmax instead of relying on in-kernel chunking alone.

    # --- padding: L first (mask=1 so padded positions get zero weight),
    #     then batch (mask=0 so fake rows stay finite; sliced off below) ---
    mask = pad_mask.astype(jnp.int32)
    if Lp != L:
        mask = jnp.pad(mask, ((0, 0), (0, Lp - L)), constant_values=1)
        k = jnp.pad(k, ((0, 0), (0, Lp - L), (0, 0)))
        v = jnp.pad(v, ((0, 0), (0, Lp - L), (0, 0)))
    if Bp != B:
        mask = jnp.pad(mask, ((0, Bp - B), (0, 0)))
        k = jnp.pad(k, ((0, Bp - B), (0, 0), (0, 0)))
        v = jnp.pad(v, ((0, Bp - B), (0, 0), (0, 0)))
        qp = jnp.pad(qp, ((0, Bp - B), (0, 0)))

    wa2 = wa.reshape(1, H).astype(f32)
    ba2 = ba.reshape(1, 1).astype(f32)

    ctx_dtype = v.dtype
    w_dtype = q.dtype

    # --- explicit VMEM budget (v5e scoped default is only 16 MiB) ---
    ksz, vsz = jnp.dtype(k.dtype).itemsize, jnp.dtype(v.dtype).itemsize
    block_bytes = (TB * Lp * H * (ksz + vsz)                 # k + v blocks
                   + TB * Lp * 4 + TB * H * 4                # mask + qp blocks
                   + TB * H * jnp.dtype(ctx_dtype).itemsize  # ctx block
                   + TB * Lp * jnp.dtype(w_dtype).itemsize)  # weights block
    chunk_tmp = 3 * TB * CL * H * 4                          # tanh / mul temporaries
    vmem_need = 2 * block_bytes + chunk_tmp + (4 << 20)      # 2x: double buffering
    vmem_limit = int(min(64 << 20, max(vmem_need, 32 << 20)))

    kernel = _make_attention_kernel(n_chunks, CL)

    ctx, w = pl.pallas_call(
        kernel,
        out_shape=(
            jax.ShapeDtypeStruct((Bp, H), ctx_dtype),
            jax.ShapeDtypeStruct((Bp, Lp), w_dtype),
        ),
        grid_spec=pltpu.PrefetchScalarGridSpec(
            num_scalar_prefetch=0,
            grid=(Bp // TB,),
            in_specs=[
                pl.BlockSpec((TB, H),     lambda b: (b, 0)),     # qp
                pl.BlockSpec((TB, Lp, H), lambda b: (b, 0, 0)),  # k
                pl.BlockSpec((TB, Lp, H), lambda b: (b, 0, 0)),  # v
                pl.BlockSpec((TB, Lp),    lambda b: (b, 0)),     # pad mask
                pl.BlockSpec((1, H),      lambda b: (0, 0)),     # wa row
                pl.BlockSpec((1, 1),      lambda b: (0, 0)),     # ba
            ],
            out_specs=[
                pl.BlockSpec((TB, H),  lambda b: (b, 0)),        # context
                pl.BlockSpec((TB, Lp), lambda b: (b, 0)),        # weights
            ],
        ),
        compiler_params=pltpu.CompilerParams(
            dimension_semantics=("parallel",),                   # batch tiles independent
            vmem_limit_bytes=vmem_limit),
    )(qp, k, v, mask, wa2, ba2)

    return ctx[:B, :], w[:B, :L]


def attention_ref(q, k, v, pad_mask, wq, bq, wa, ba):
    """Pure-JAX reference mirroring the PyTorch forward."""
    qp = q @ wq.T + bq                                   # (B, H)
    mid = jnp.tanh(k + qp[:, None, :])                   # (B, L, H)
    logits = (mid @ wa.T + ba)[..., 0]                   # (B, L)
    logits = jnp.where(pad_mask, -jnp.inf, logits)
    weights = jax.nn.softmax(logits, axis=1)
    context = jnp.einsum('bl,blh->bh', weights, v)
    return context, weights


if __name__ == "__main__":
    B, L, H = 2, 8, 32

    key = jax.random.PRNGKey(0)
    kq, kk, kv, kw1, kb1, kw2, kb2 = jax.random.split(key, 7)

    q = jax.random.normal(kq, (B, H), dtype=jnp.float32)
    k = jax.random.normal(kk, (B, L, H), dtype=jnp.float32)
    v = jax.random.normal(kv, (B, L, H), dtype=jnp.float32)

    # pad_mask: True (1) == padding. Pad last 2 steps of batch 0, last 3 of batch 1.
    lengths = jnp.array([L - 2, L - 3])
    pad_mask = jnp.arange(L)[None, :] >= lengths[:, None]   # (B, L) bool

    # Deterministic parameter init (linear_q: HxH, linear_attn: 1xH).
    wq = jax.random.normal(kw1, (H, H), dtype=jnp.float32) * 0.1
    bq = jax.random.normal(kb1, (H,), dtype=jnp.float32) * 0.1
    wa = jax.random.normal(kw2, (1, H), dtype=jnp.float32) * 0.1
    ba = jax.random.normal(kb2, (1,), dtype=jnp.float32) * 0.1

    ctx, weights = attention_pallas(q, k, v, pad_mask, wq, bq, wa, ba)
    jax.block_until_ready((ctx, weights))

    ctx_exp, w_exp = attention_ref(q, k, v, pad_mask, wq, bq, wa, ba)
    assert ctx.shape == (B, H) and weights.shape == (B, L)
    np.testing.assert_allclose(np.asarray(ctx), np.asarray(ctx_exp),
                               rtol=1e-5, atol=1e-5)
    np.testing.assert_allclose(np.asarray(weights), np.asarray(w_exp),
                               rtol=1e-5, atol=1e-5)

    print("KERNEL_OK")
</pallas_src>

<mosaic_0001>
module attributes {stable_mosaic.version = 11 : i64} {
  func.func @kernel(%arg0: i32, %arg1: memref<2x32xf32, #tpu.memory_space<vmem>>, %arg2: memref<2x8x32xf32, #tpu.memory_space<vmem>>, %arg3: memref<2x8x32xf32, #tpu.memory_space<vmem>>, %arg4: memref<2x8xi32, #tpu.memory_space<vmem>>, %arg5: memref<1x32xf32, #tpu.memory_space<vmem>>, %arg6: memref<1x1xf32, #tpu.memory_space<vmem>>, %arg7: memref<2x32xf32, #tpu.memory_space<vmem>>, %arg8: memref<2x8xf32, #tpu.memory_space<vmem>>) attributes {dimension_semantics = [#tpu.dimension_semantics<parallel>], iteration_bounds = array<i64: 1>, scalar_prefetch = 0 : i64, scratch_operands = 0 : i64, tpu.core_type = #tpu.core_type<tc>, window_params = [{transform_indices = @transform_0, window_bounds = array<i64: 2, 32>}, {transform_indices = @transform_1, window_bounds = array<i64: 2, 8, 32>}, {transform_indices = @transform_2, window_bounds = array<i64: 2, 8, 32>}, {transform_indices = @transform_3, window_bounds = array<i64: 2, 8>}, {pipeline_mode = #tpu.pipeline_mode<synchronous>, transform_indices = @transform_4, window_bounds = array<i64: 1, 32>}, {pipeline_mode = #tpu.pipeline_mode<synchronous>, transform_indices = @transform_5, window_bounds = array<i64: 1, 1>}, {transform_indices = @transform_6, window_bounds = array<i64: 2, 32>}, {transform_indices = @transform_7, window_bounds = array<i64: 2, 8>}]} {
    %c0 = arith.constant 0 : index
    %c0_0 = arith.constant 0 : index
    %0 = vector.load %arg1[%c0, %c0_0] : memref<2x32xf32, #tpu.memory_space<vmem>>, vector<2x32xf32>
    %c0_1 = arith.constant 0 : index
    %c0_2 = arith.constant 0 : index
    %1 = vector.load %arg5[%c0_1, %c0_2] : memref<1x32xf32, #tpu.memory_space<vmem>>, vector<1x32xf32>
    %c0_3 = arith.constant 0 : index
    %c0_4 = arith.constant 0 : index
    %c0_5 = arith.constant 0 : index
    %2 = vector.load %arg2[%c0_3, %c0_4, %c0_5] : memref<2x8x32xf32, #tpu.memory_space<vmem>>, vector<2x8x32xf32>
    %3 = vector.shape_cast %0 : vector<2x32xf32> to vector<2x1x32xf32>
    %4 = vector.broadcast %3 : vector<2x1x32xf32> to vector<2x8x32xf32>
    %5 = arith.addf %2, %4 : vector<2x8x32xf32>
    %6 = math.tanh %5 : vector<2x8x32xf32>
    %7 = vector.shape_cast %1 : vector<1x32xf32> to vector<1x1x32xf32>
    %8 = vector.broadcast %7 : vector<1x1x32xf32> to vector<2x8x32xf32>
    %9 = arith.mulf %6, %8 : vector<2x8x32xf32>
    %cst = arith.constant dense<0.000000e+00> : vector<2x8xf32>
    %10 = vector.multi_reduction <add>, %9, %cst [2] : vector<2x8x32xf32> to vector<2x8xf32>
    %c0_6 = arith.constant 0 : index
    %c0_7 = arith.constant 0 : index
    %11 = vector.load %arg6[%c0_6, %c0_7] : memref<1x1xf32, #tpu.memory_space<vmem>>, vector<1x1xf32>
    %12 = vector.broadcast %11 : vector<1x1xf32> to vector<2x8xf32>
    %13 = arith.addf %10, %12 : vector<2x8xf32>
    %c0_8 = arith.constant 0 : index
    %c0_9 = arith.constant 0 : index
    %14 = vector.load %arg4[%c0_8, %c0_9] : memref<2x8xi32, #tpu.memory_space<vmem>>, vector<2x8xi32>
    %c0_i32 = arith.constant 0 : i32
    %15 = vector.broadcast %c0_i32 : i32 to vector<2x8xi32>
    %16 = arith.cmpi sgt, %14, %15 : vector<2x8xi32>
    %cst_10 = arith.constant 0xFF800000 : f32
    %17 = vector.broadcast %cst_10 : f32 to vector<2x8xf32>
    %18 = arith.select %16, %17, %13 : vector<2x8xi1>, vector<2x8xf32>
    %cst_11 = arith.constant dense<0xFF800000> : vector<2xf32>
    %19 = vector.multi_reduction <maximumf>, %18, %cst_11 [1] : vector<2x8xf32> to vector<2xf32>
    %20 = vector.shape_cast %19 : vector<2xf32> to vector<2x1xf32>
    %21 = vector.broadcast %20 : vector<2x1xf32> to vector<2x8xf32>
    %22 = arith.subf %18, %21 : vector<2x8xf32>
    %23 = math.exp %22 : vector<2x8xf32>
    %cst_12 = arith.constant dense<0.000000e+00> : vector<2xf32>
    %24 = vector.multi_reduction <add>, %23, %cst_12 [1] : vector<2x8xf32> to vector<2xf32>
    %25 = vector.shape_cast %24 : vector<2xf32> to vector<2x1xf32>
    %26 = tpu.reciprocal %25 : vector<2x1xf32> -> vector<2x1xf32>
    %27 = vector.broadcast %26 : vector<2x1xf32> to vector<2x8xf32>
    %28 = arith.mulf %23, %27 : vector<2x8xf32>
    %c0_13 = arith.constant 0 : index
    %c0_14 = arith.constant 0 : index
    %29 = vector.load %arg8[%c0_13, %c0_14] : memref<2x8xf32, #tpu.memory_space<vmem>>, vector<2x8xf32>
    tpu.vector_store %arg8[%c0_13, %c0_14], %28 {strides = array<i32>} : memref<2x8xf32, #tpu.memory_space<vmem>>, vector<2x8xf32>,
    %30 = vector.shape_cast %28 : vector<2x8xf32> to vector<2x1x8xf32>
    %c0_15 = arith.constant 0 : index
    %c0_16 = arith.constant 0 : index
    %c0_17 = arith.constant 0 : index
    %31 = vector.load %arg3[%c0_15, %c0_16, %c0_17] : memref<2x8x32xf32, #tpu.memory_space<vmem>>, vector<2x8x32xf32>
    "tpu.trace_start"() <{level = 10 : i32, message = "bql,blh->bqh"}> : () -> ()
    %cst_18 = arith.constant dense<0.000000e+00> : vector<2x1x32xf32>
    %32 = tpu.matmul %30, %31, %cst_18 {dimension_numbers = #tpu.dot_dimension_numbers<[2], [1], [1], [2], [0, 0, 0, 1, 1, 2], [0], [0]>} : vector<2x1x8xf32>, vector<2x8x32xf32>, vector<2x1x32xf32> -> vector<2x1x32xf32>
    "tpu.trace_stop"() : () -> ()
    %33 = vector.shape_cast %32 : vector<2x1x32xf32> to vector<2x32xf32>
    %c0_19 = arith.constant 0 : index
    %c0_20 = arith.constant 0 : index
    %34 = vector.load %arg7[%c0_19, %c0_20] : memref<2x32xf32, #tpu.memory_space<vmem>>, vector<2x32xf32>
    tpu.vector_store %arg7[%c0_19, %c0_20], %33 {strides = array<i32>} : memref<2x32xf32, #tpu.memory_space<vmem>>, vector<2x32xf32>,
    return
  }
  func.func @transform_0(%arg0: i32) -> (i32, i32) {
    %c0_i32 = arith.constant 0 : i32
    %c0_i32_0 = arith.constant 0 : i32
    return %arg0, %c0_i32 : i32, i32
  }
  func.func @transform_1(%arg0: i32) -> (i32, i32, i32) {
    %c0_i32 = arith.constant 0 : i32
    %c0_i32_0 = arith.constant 0 : i32
    %c0_i32_1 = arith.constant 0 : i32
    return %arg0, %c0_i32, %c0_i32_0 : i32, i32, i32
  }
  func.func @transform_2(%arg0: i32) -> (i32, i32, i32) {
    %c0_i32 = arith.constant 0 : i32
    %c0_i32_0 = arith.constant 0 : i32
    %c0_i32_1 = arith.constant 0 : i32
    return %arg0, %c0_i32, %c0_i32_0 : i32, i32, i32
  }
  func.func @transform_3(%arg0: i32) -> (i32, i32) {
    %c0_i32 = arith.constant 0 : i32
    %c0_i32_0 = arith.constant 0 : i32
    return %arg0, %c0_i32 : i32, i32
  }
  func.func @transform_4(%arg0: i32) -> (i32, i32) {
    %c0_i32 = arith.constant 0 : i32
    %c0_i32_0 = arith.constant 0 : i32
    %c0_i32_1 = arith.constant 0 : i32
    return %c0_i32, %c0_i32_0 : i32, i32
  }
  func.func @transform_5(%arg0: i32) -> (i32, i32) {
    %c0_i32 = arith.constant 0 : i32
    %c0_i32_0 = arith.constant 0 : i32
    %c0_i32_1 = arith.constant 0 : i32
    return %c0_i32, %c0_i32_0 : i32, i32
  }
  func.func @transform_6(%arg0: i32) -> (i32, i32) {
    %c0_i32 = arith.constant 0 : i32
    %c0_i32_0 = arith.constant 0 : i32
    return %arg0, %c0_i32 : i32, i32
  }
  func.func @transform_7(%arg0: i32) -> (i32, i32) {
    %c0_i32 = arith.constant 0 : i32
    %c0_i32_0 = arith.constant 0 : i32
    return %arg0, %c0_i32 : i32, i32
  }
}

</mosaic_0001>

<bundles_post_ra>
// kernel: tpu_custom_call.1
= control target key start
LH: loop header
LB: loop body
LE: loop exit
PB: predicated region body
PF: predicated region fallthrough
CT: control target
= control target key end

     0   :  { %s576_s0 = inlined_call_operand.vmem [shape: f32[2,32], index: 0, kind: input, shape index: {}]   ;;  %s577_s1 = inlined_call_operand.hbm [shape: f32[2,8,32], index: 1, kind: input, shape index: {}]   ;;  %s578_s2 = inlined_call_operand.hbm [shape: f32[2,8,32], index: 2, kind: input, shape index: {}]   ;;  %s579_s3 = inlined_call_operand.vmem [shape: s32[2,8], index: 3, kind: input, shape index: {}]   ;;  %s580_s4 = inlined_call_operand.vmem [shape: f32[1,32], index: 4, kind: input, shape index: {}]   ;;  %s581_s5 = inlined_call_operand.<no memory space> [shape: f32[1,1], index: 5, kind: input, shape index: {}]   ;;  %s582_s6 = inlined_call_operand.hbm [shape: f32[2,32], index: 6, kind: output, shape index: {0}]   ;;  %s583_s7 = inlined_call_operand.hbm [shape: f32[2,8], index: 7, kind: output, shape index: {1}]  }
   0x1   :  { %v13_v0 = vstv %s581_s5 }
   0x2   :  { %14 = vst [vmem:[#allocation2] sm:$0x1] %v13_v0 }
   0x3   :  { %15 = vsyncpa [#allocation4], 0 }
   0x4   :  { %16 = vsyncpa [#allocation7], 0 }
   0x5   :  { %17 = vsyncpa [#allocation5], 0 }
   0x6   :  { %18 = vsyncpa [#allocation10], 0  ;;  %s490_s26 = smov [#allocation3]  }
   0x7   :  { %s26_s27 = sshll.u32 %s490_s26, 4  ;;  %s27_s27 = int_to_ptr.vmem [resolvable:$true] %s26_s27 }
   0x8   :  { %s410_s28 = scalar_lea.vmem %s27_s27, 256  ;;  %p415_p1 = scmp.lt.s32.totalorder %s27_s27, %s27_s27 }
   0x9   :  { %p411_p0 = scmp.ne.s32.totalorder %s27_s27, %s410_s28  ;;  %p416_p2 = scmp.lt.s32.totalorder %s410_s28, %s410_s28 }
   0xb   :  { %p417_p3 = por %p416_p2, %p415_p1 }
   0xd   :  { %p418_p4 = pnand %p417_p3, %p411_p0 }
   0xf   :  { %421 = shalt.err (!%p418_p4)
}
  0x10   :  { %s491_s29 = smov 128   ;;  %s492_s30 = smov 8  }
  0x11   :  { %32 = dma.hbm_to_vmem [thread:$0]  %s577_s1, 256, %s27_s27, [#allocation4], %s491_s29, %s491_s29, %s492_s30  }
  0x12   :  { %s493_s5 = smov [#allocation6]  }
  0x13   :  { %s38_s10 = sshll.u32 %s493_s5, 4  ;;  %s39_s10 = int_to_ptr.vmem [resolvable:$true] %s38_s10 }
  0x14   :  { %s430_s11 = scalar_lea.vmem %s39_s10, 256  ;;  %p435_p6 = scmp.lt.s32.totalorder %s39_s10, %s39_s10 }
  0x15   :  { %p431_p5 = scmp.ne.s32.totalorder %s39_s10, %s430_s11  ;;  %p436_p7 = scmp.lt.s32.totalorder %s430_s11, %s430_s11 }
  0x17   :  { %p437_p8 = por %p436_p7, %p435_p6 }
  0x19   :  { %p438_p9 = pnand %p437_p8, %p431_p5 }
  0x1b   :  { %441 = shalt.err (!%p438_p9)
}
  0x1c   :  { %44 = dma.hbm_to_vmem [thread:$0]  %s578_s2, 256, %s39_s10, [#allocation7], %s491_s29, %s491_s29, %s492_s30  }
  0x1d   :  { %482 = dma.done.wait [#allocation4], 256  }
  0x1e   :  { %483 = vsyncadd [#allocation4], 4294967040 }
  0x1f   :  { %484 = dma.done.wait [#allocation7], 256  }
  0x20   :  { %485 = vsyncadd [#allocation7], 4294967040  ;;  %v73_v1 = vlaneseq  ;;  %v494_v2 = vmov 1966171168   ;;  %v495_v4 = vmov 0   ;;  %v59_v15 = vld [vmem:[#allocation3] sm:$0xff] }
  0x21   :  { %v71_v3 = vunpack.c.l.s4 %v494_v2  ;;  %392 = vset.pattern.permute.xlu1 %v495_v4  ;;  %393 = vset.pattern.permute.xlu0 %v495_v4  ;;  %v363_v11 = vld.sshfl [vmem:[%s576_s0] sm:$0x11 pattern:$0x75316420]  ;;  %v60_v18 = vld [vmem:[#allocation3 + $0x8] sm:$0xff]  ;;  %vm106_vm0 = vcmask 261120  }
  0x22   :  { %v74_v5 = vshrl.u32 %v73_v1, 7  ;;  %v130_v7 = vand.u32 127, %v73_v1  ;;  %v69_v13 = vcombine.high %v363_v11, %v363_v11  ;;  %v365_v14 = vld [vmem:[#allocation2] ss:$0 sm:$0xff]  ;;  %vm139_vm1 = vcmask 1041409   ;;  %v179_v45 = vld [vmem:[#allocation6] sm:$0xff] }
  0x23   :  { %v72_v6 = vunpack.c.0.s8 %v71_v3  ;;  %120 = vperm.xlu1 %392, %v365_v14   ;;  %v364_v22 = vld [vmem:[%s580_s4] ss:$0 sm:$0xff]  ;;  %vm143_vm3 = vcmask 58368   ;;  %v496_v46 = vmov 0.0   ;;  %vm497_vm4 = vmmov 0  }
  0x24   :  { %v86_v9 = vsub.s32 0, %v74_v5  ;;  %v133_v10 = vsub.s32 %v130_v7, %v74_v5  ;;  %v125_v33 = vld [vmem:[%s579_s3] sm:$0x3]  ;;  %372 = vmatprep.subr.mxu0 %v496_v46  ;;  %374 = vmatprep.mubr.msk.f32.mxu0 %vm497_vm4, %v496_v46  ;;  %vm181_vm5 = vcmask 64512   ;;  %s498_s3 = smov [#allocation9]  }
  0x25   :  { %v549_v8 = vsub.s32 %v72_v6, %v74_v5  ;;  %vm126_vm2 = vcmp.gt.s32.totalorder %v125_v33, 0  ;;  %373 = vmatpush3.msra.mxu0 %v179_v45  ;;  %377 = vmatprep.subr.mxu1 %v496_v46  ;;  %v180_v47 = vld [vmem:[#allocation6 + $0x8] sm:$0xff]  ;;  %s349_s4 = sshll.u32 %s498_s3, 4  ;;  %s350_s4 = int_to_ptr.vmem [resolvable:$true] %s349_s4 }
  0x26   :  { %379 = vmatprep.mubr.msk.f32.mxu1 %vm497_vm4, %v496_v46  ;;  %378 = vmatpush3.msra.mxu1 %v180_v47  ;;  %s442_s17 = scalar_lea.vmem %s350_s4, 32  ;;  %p447_p11 = scmp.lt.s32.totalorder %s350_s4, %s350_s4 }
  0x27   :  { %v76_v12 = vrot.slane %v363_v11, %v549_v8  ;;  %v83_v17 = vrot.slane %v69_v13, %v549_v8  ;;  %p443_p10 = scmp.ne.s32.totalorder %s350_s4, %s442_s17  ;;  %p448_p12 = scmp.lt.s32.totalorder %s442_s17, %s442_s17 }
  0x29   :  { %v87_v16 = vrot.slane %v76_v12, %v86_v9  ;;  %v91_v20 = vrot.slane %v83_v17, %v86_v9  ;;  %p449_p13 = por %p448_p12, %p447_p11 }
  0x2b   :  { %v94_v19 = vadd.f32 %v87_v16, %v59_v15  ;;  %v95_v21 = vadd.f32 %v91_v20, %v60_v18  ;;  %p450_p0 = pnand %p449_p13, %p443_p10 }
  0x2d   :  { %394 = vtanh.f32 %v94_v19 }
  0x2e   :  { %396 = vtanh.f32 %v95_v21 }
  0x3a   :  { %v395_v23 = vpop.eup %394 }
  0x3b   :  { %v104_v24 = vmul.f32 %v395_v23, %v364_v22  ;;  %v397_v25 = vpop.eup %396 }
  0x3c   :  { %v105_v27 = vmul.f32 %v397_v25, %v364_v22 }
  0x3d   :  { %v107_v26 = vsel %vm106_vm0, %v104_v24, 0.0 }
  0x3e   :  { %108 = vadd.xlane.f32.xlu0 %v107_v26  ;;  %v110_v28 = vsel %vm106_vm0, %v105_v27, 0.0 }
  0x42   :  { %111 = vadd.xlane.f32.xlu0 %v110_v28 }
  0x9e   :  { %v121_v29 = vpop.permute.xlu1 %120 }
  0xc7   :  { %v109_v30 = vpop.xlane.xlu0 %108 }
  0xc8   :  { %v123_v31 = vadd.f32 %v121_v29, %v109_v30 }
  0xca   :  { %v134_v35 = vrot.slane %v123_v31, %v133_v10 }
  0xcb   :  { %v112_v32 = vpop.xlane.xlu0 %111 }
  0xcc   :  { %v124_v34 = vadd.f32 %v121_v29, %v112_v32 }
  0xce   :  { %v138_v36 = vrot.slane %v124_v34, %v133_v10 }
  0xd0   :  { %v140_v37 = vsel %vm139_vm1, %v138_v36, %v134_v35 }
  0xd1   :  { %v142_v38 = vsel %vm126_vm2, -inf, %v140_v37 }
  0xd2   :  { %v144_v39 = vsel %vm143_vm3, %v142_v38, -inf }
  0xd3   :  { %145 = vmax.xlane.f32.xlu1 %v144_v39 }
 0x15c   :  { %v146_v40 = vpop.xlane.xlu1 %145 }
 0x15d   :  { %v147_v41 = vsub.f32 %v142_v38, %v146_v40 }
 0x15f   :  { %v148_v42 = vmul.f32 1.442695, %v147_v41 }
 0x161   :  { %398 = vpow2.f32 %v148_v42 }
 0x16e   :  { %v399_v43 = vpop.eup %398 }
 0x16f   :  { %v150_v44 = vsel %vm143_vm3, %v399_v43, 0.0 }
 0x170   :  { %151 = vadd.xlane.f32.xlu0 %v150_v44 }
 0x1f9   :  { %v152_v48 = vpop.xlane.xlu0 %151 }
 0x1fa   :  { %400 = vrcp.f32 %v152_v48 }
 0x207   :  { %v401_v49 = vpop.eup %400 }
 0x208   :  { %v154_v50 = vmul.f32 %v401_v49, %v399_v43 }
 0x20a   :  { %v163_v51 = vrot.slane %v154_v50, %v549_v8  ;;  %155 = vst.msk [vmem:[#allocation9] sm:$0x3] %vm143_vm3, %v154_v50 }
 0x20c   :  { %v171_v52 = vrot.slane %v163_v51, %v549_v8  ;;  %v164_v53 = vcombine.high %v163_v51, %v163_v51 }
 0x20e   :  { %375 = vmatmul.mubr.msk.f32.vlgmr.msra.gmra.mxu0 %vm181_vm5, %v171_v52  ;;  %v178_v54 = vrot.slane %v164_v53, %v549_v8 }
 0x210   :  { %380 = vmatmul.mubr.msk.f32.vlgmr.msra.gmra.mxu1 %vm181_vm5, %v178_v54 }
 0x211   :  { %453 = shalt.err (!%p450_p0)
}
 0x212   :  { %352 = dma.vmem_to_hbm [thread:$0]  %s350_s4, 32, %s583_s7, [#allocation10]   ;;  %vm331_vm6 = vcmask 254976  }
 0x213   :  { %s499_s20 = smov [#allocation8]  }
 0x214   :  { %s339_s21 = sshll.u32 %s499_s20, 4  ;;  %s340_s21 = int_to_ptr.vmem [resolvable:$true] %s339_s21 }
 0x215   :  { %s462_s22 = scalar_lea.vmem %s340_s21, 32  ;;  %p467_p2 = scmp.lt.s32.totalorder %s340_s21, %s340_s21 }
 0x216   :  { %p463_p1 = scmp.ne.s32.totalorder %s340_s21, %s462_s22  ;;  %p468_p3 = scmp.lt.s32.totalorder %s462_s22, %s462_s22 }
 0x218   :  { %p469_p4 = por %p468_p3, %p467_p2 }
 0x21a   :  { %p470_p5 = pnand %p469_p4, %p463_p1 }
 0x2ce   :  { %v250_v55 = vpop.f32.mrf.mxu0 }
 0x2d0   :  { %v376_v56 = vpop.f32.mrf.mxu0  ;;  %v322_v57 = vpop.f32.mrf.mxu1 }
 0x2d1   :  { %v328_v58 = vrot.slane %v322_v57, 7 }
 0x2d2   :  { %v381_v59 = vpop.f32.mrf.mxu1 }
 0x2d3   :  { %v329_v60 = vsel %vm139_vm1, %v328_v58, %v250_v55 }
 0x2d4   :  { %332 = vst.msk [vmem:[#allocation8] sm:$0x3] %vm331_vm6, %v329_v60 }
 0x2d5   :  { %473 = shalt.err (!%p470_p5)
}
 0x2d6   :  { %342 = dma.vmem_to_hbm [thread:$0]  %s340_s21, 32, %s582_s6, [#allocation5]  }
 0x2d7   :  { %486 = dma.done.wait [#allocation5], 32  }
 0x2d8   :  { %487 = vsyncadd [#allocation5], 4294967264 }
 0x2d9   :  { %488 = dma.done.wait [#allocation10], 32  }
 0x2da   :  { %489 = vsyncadd [#allocation10], 4294967264 }
 0x2db   :  { %359 = vsyncpa [#allocation4], 1 }
 0x2dc   :  { %360 = vsyncpa [#allocation7], 1 }
 0x2dd   :  { %361 = vsyncpa [#allocation5], 1 }
 0x2de   :  { %362 = vsyncpa [#allocation10], 1 }

</bundles_post_ra>
